<compile_context>
chip_gen: v5e
topology: v5e:2x2
jax: 0.10.0
libtpu: 0.0.40
codegen_flags: <defaults>
</compile_context>

<pallas_src>
import functools

import jax
import jax.numpy as jnp
from jax.experimental import pallas as pl
from jax.experimental.pallas import tpu as pltpu


_LANE = 128       # output lane tile granularity
_SUBLANE = 8      # row tile granularity
_TM_MAX = 4096    # max rows per tile (amortizes ~0.35 us per grid step)
_TN_MAX = 512     # max output columns per tile (only used when N % 128 == 0)


def _cdiv(a, b):
    return -(-a // b)


def _round_up(x, m):
    return _cdiv(x, m) * m


@functools.lru_cache(maxsize=1)
def _vmem_budgets():
    """(operand byte budget, scoped vmem limit) sized per TPU generation."""
    try:
        cap = getattr(pltpu.get_tpu_info(), "vmem_capacity_bytes", None)
    except Exception:
        cap = None
    if not cap:
        cap = 64 * 1024 * 1024            # conservative: v7x physical VMEM
    limit = min((cap * 3) // 4, 96 * 1024 * 1024)   # 96 MiB on v5e/v6e, 48 MiB on v7x
    budget = limit // 2                              # headroom for compiler scratch
    return budget, limit


def _sine_kernel(x_ref, w_ref, b_ref, o_ref, *, compute_dtype):
    # x_ref : (tm, K)   input row tile (streamed)
    # w_ref : (K, tn)   pre-transposed weight tile (omega folded, resident per column tile)
    # b_ref : (1, tn)   bias row, f32 (omega folded)
    # o_ref : (tm, tn)  output tile
    x = x_ref[...]
    if compute_dtype is not None and x.dtype != jnp.dtype(compute_dtype):
        x = x.astype(compute_dtype)        # in-kernel cast: hidden under MXU/DMA
    acc = jnp.dot(x, w_ref[...], preferred_element_type=jnp.float32)
    acc = acc + b_ref[...]                 # broadcast (1, tn) over rows, f32
    # TODO(synk): if bundle analysis shows the VALU saturating on sin for very
    # wide layers, evaluate a reduced-range / bf16 polynomial (v6e/v7x only).
    o_ref[...] = jnp.sin(acc).astype(o_ref.dtype)


def prepare_sine_params(weight, bias, omega=30.0, *, compute_dtype=None):
    """One-time static parameter prep (hoist out of the per-call path).

    weight : (out_features, in_features)  -- nn.Linear layout
    bias   : (out_features,) or None
    Returns (w_kn, b_row): weight transposed to (K, N) with omega folded
    (optionally cast to `compute_dtype`), and bias as an f32 (1, N) row.
    """
    N, K = weight.shape
    w32 = weight.astype(jnp.float32) * jnp.float32(omega)   # fold in f32, then cast
    if bias is None:
        b32 = jnp.zeros((N,), jnp.float32)
    else:
        b32 = bias.astype(jnp.float32) * jnp.float32(omega)
    w_kn = w32.T                                             # (K, N): plain MXU layout
    if compute_dtype is not None:
        w_kn = w_kn.astype(compute_dtype)
    return w_kn, b32.reshape(1, N)


def sine_forward_prepared(x, w_kn, b_row, *, compute_dtype=None, out_dtype=None,
                          tile_rows=None, tile_cols=None):
    """sin(x @ w_kn + b_row) with omega already folded into w_kn / b_row."""
    out_dtype = x.dtype if out_dtype is None else out_dtype
    *lead, K = x.shape
    K_w, N = w_kn.shape
    assert K == K_w, "in_features mismatch"
    assert b_row.shape == (1, N), "bias must be prepared to shape (1, N)"

    M = 1
    for d in lead:
        M *= d
    x2 = x.reshape(M, K)

    # ---- output column tile (lane axis): multiple of 128 or the full dim ----
    if tile_cols is not None:
        tn = int(tile_cols)
        if tn >= N:
            tn = N
        else:
            assert tn % _LANE == 0, "tile_cols must be a multiple of 128 or >= N"
    elif N % _LANE == 0 and N > _TN_MAX:
        tn = _TN_MAX
    else:
        tn = N                      # full-dim block: legal for any N, masked stores
    num_n = _cdiv(N, tn)

    # ---- row tile from a generation-aware VMEM budget ----
    x_bytes = x2.dtype.itemsize
    w_bytes = w_kn.dtype.itemsize
    o_bytes = jnp.dtype(out_dtype).itemsize
    budget, vmem_limit = _vmem_budgets()

    # (8,128)-tiled footprints, default double-buffering on every operand.
    K_lane = _round_up(K, _LANE)          # lane dim of the x tile
    K_sub = _round_up(K, _SUBLANE)        # sublane dim of the (K, tn) weight tile
    tn_lane = _round_up(tn, _LANE)
    fixed = 2 * K_sub * tn_lane * w_bytes + 2 * _SUBLANE * tn_lane * 4
    per_row = 2 * K_lane * x_bytes + 2 * tn_lane * o_bytes

    if tile_rows is not None:
        tm = int(tile_rows)
        if tm >= M:
            tm = M
        else:
            assert tm % _SUBLANE == 0, "tile_rows must be a multiple of 8 or >= M"
    else:
        tm_cap = (budget - fixed) // max(per_row, 1)
        tm = min(max(tm_cap, _SUBLANE), _TM_MAX)
        tm = max(_SUBLANE, (tm // _SUBLANE) * _SUBLANE)
        if tm >= M:
            tm = M
        # Force >= 2 grid steps so a v7x megacore can shard (harmless on 1-TC chips).
        if _cdiv(M, tm) * num_n == 1 and M >= 2 * _SUBLANE:
            tm = _round_up(_cdiv(M, 2), _SUBLANE)
    num_m = _cdiv(M, tm)

    cost = pl.CostEstimate(
        flops=2 * M * K * N,
        transcendentals=M * N,
        bytes_accessed=M * K * x_bytes + K * N * w_bytes + 4 * N + M * N * o_bytes,
    )

    kernel = functools.partial(_sine_kernel, compute_dtype=compute_dtype)

    out = pl.pallas_call(
        kernel,
        out_shape=jax.ShapeDtypeStruct((M, N), out_dtype),
        grid_spec=pltpu.PrefetchScalarGridSpec(
            num_scalar_prefetch=0,
            grid=(num_m, num_n),
            in_specs=[
                pl.BlockSpec((tm, K), lambda i, j: (i, 0)),   # x row tile (streamed)
                # TODO(synk): single-buffer these constant-per-row operands
                # (pipeline_mode=pl.Buffered(1)) once verified on the target
                # jax version; frees ~half the weight VMEM on v7x.
                pl.BlockSpec((K, tn), lambda i, j: (0, j)),   # weight column tile
                pl.BlockSpec((1, tn), lambda i, j: (0, j)),   # bias row slice
            ],
            out_specs=pl.BlockSpec((tm, tn), lambda i, j: (i, j)),
        ),
        compiler_params=pltpu.CompilerParams(
            dimension_semantics=("parallel", "parallel"),
            vmem_limit_bytes=vmem_limit,
        ),
        cost_estimate=cost,
    )(x2, w_kn, b_row)

    return out.reshape(*lead, N)


def sine_forward(x, weight, bias=None, omega=30.0, *, use_bf16_inputs=False,
                 out_dtype=None, tile_rows=None, tile_cols=None):
    """SIREN Sine layer: sin(omega * (x @ weight.T + bias)).

    x      : (..., in_features)
    weight : (out_features, in_features)  -- nn.Linear layout
    bias   : (out_features,) or None
    """
    compute_dtype = jnp.bfloat16 if use_bf16_inputs else None
    w_kn, b_row = prepare_sine_params(weight, bias, omega, compute_dtype=compute_dtype)
    return sine_forward_prepared(x, w_kn, b_row, compute_dtype=compute_dtype,
                                 out_dtype=out_dtype, tile_rows=tile_rows,
                                 tile_cols=tile_cols)


def init_sine_params(key, in_features, out_features, first_layer, omega=30.0):
    """Deterministic SIREN init (matches the usual Sine-layer scheme)."""
    kw, kb = jax.random.split(key)
    if first_layer:
        bound = 1.0 / in_features
    else:
        bound = float(jnp.sqrt(6.0 / in_features)) / omega
    weight = jax.random.uniform(kw, (out_features, in_features), jnp.float32,
                                -bound, bound)
    bias = jax.random.uniform(kb, (out_features,), jnp.float32, -bound, bound)
    return weight, bias


if __name__ == "__main__":
    key = jax.random.PRNGKey(0)
    k1, k2, k3, k4, k5, k6 = jax.random.split(key, 6)
    omega = 30.0

    # 1) SIREN first layer: coordinate input K=3, N=64 (lane-unaligned output
    #    -> full-dim masked stores, no pad/slice), leading dims folded.
    x = jax.random.normal(k1, (2, 16, 3), jnp.float32)
    w, b = init_sine_params(k2, 3, 64, first_layer=True, omega=omega)
    out = jax.block_until_ready(sine_forward(x, w, b, omega=omega))
    ref = jnp.sin(omega * (x @ w.T + b))
    assert out.shape == (2, 16, 64)
    assert jnp.allclose(out, ref, atol=1e-4, rtol=1e-4), "f32 mismatch (first layer)"

    # 2) Hidden layer with ragged last row tile (M=100, tile_rows=32).
    x2 = jax.random.normal(k3, (100, 32), jnp.float32)
    w2, b2 = init_sine_params(k4, 32, 256, first_layer=False, omega=omega)
    out2 = jax.block_until_ready(sine_forward(x2, w2, b2, omega=omega, tile_rows=32))
    ref2 = jnp.sin(omega * (x2 @ w2.T + b2))
    assert out2.shape == (100, 256)
    assert jnp.allclose(out2, ref2, atol=1e-4, rtol=1e-4), "f32 mismatch (ragged rows)"

    # 3) bf16 fast path + column tiling with a ragged last column tile
    #    (N=384, tile_cols=256), using the prepared-params entry point.
    x3 = jax.random.normal(k5, (64, 16), jnp.float32)
    w3, b3 = init_sine_params(k6, 16, 384, first_layer=False, omega=omega)
    w_kn, b_row = prepare_sine_params(w3, b3, omega, compute_dtype=jnp.bfloat16)
    out3 = jax.block_until_ready(
        sine_forward_prepared(x3, w_kn, b_row, compute_dtype=jnp.bfloat16,
                              tile_cols=256))
    ref3 = jnp.sin(omega * (x3 @ w3.T + b3))
    assert out3.shape == (64, 384)
    assert float(jnp.max(jnp.abs(out3 - ref3))) < 0.1, "bf16-input path mismatch"

    # 4) bf16 output stream (halves the dominant store traffic).
    out4 = jax.block_until_ready(
        sine_forward(x2, w2, b2, omega=omega, out_dtype=jnp.bfloat16))
    assert out4.dtype == jnp.bfloat16
    assert float(jnp.max(jnp.abs(out4.astype(jnp.float32) - ref2))) < 0.05, \
        "bf16-output path mismatch"

    print("KERNEL_OK")
</pallas_src>

<mosaic_0001>
module attributes {stable_mosaic.version = 11 : i64} {
  func.func @_sine_kernel(%arg0: i32, %arg1: i32, %arg2: memref<16x3xf32, #tpu.memory_space<vmem>>, %arg3: memref<3x64xf32, #tpu.memory_space<vmem>>, %arg4: memref<1x64xf32, #tpu.memory_space<vmem>>, %arg5: memref<16x64xf32, #tpu.memory_space<vmem>>) attributes {dimension_semantics = [#tpu.dimension_semantics<parallel>, #tpu.dimension_semantics<parallel>], iteration_bounds = array<i64: 2, 1>, scalar_prefetch = 0 : i64, scratch_operands = 0 : i64, tpu.core_type = #tpu.core_type<tc>, window_params = [{transform_indices = @transform_0, window_bounds = array<i64: 16, 3>}, {transform_indices = @transform_1, window_bounds = array<i64: 3, 64>}, {transform_indices = @transform_2, window_bounds = array<i64: 1, 64>}, {transform_indices = @transform_3, window_bounds = array<i64: 16, 64>}]} {
    %c0 = arith.constant 0 : index
    %c0_0 = arith.constant 0 : index
    %0 = vector.load %arg2[%c0, %c0_0] : memref<16x3xf32, #tpu.memory_space<vmem>>, vector<16x3xf32>
    %c0_1 = arith.constant 0 : index
    %c0_2 = arith.constant 0 : index
    %1 = vector.load %arg3[%c0_1, %c0_2] : memref<3x64xf32, #tpu.memory_space<vmem>>, vector<3x64xf32>
    %cst = arith.constant dense<0.000000e+00> : vector<16x64xf32>
    %2 = tpu.matmul %0, %1, %cst {dimension_numbers = #tpu.dot_dimension_numbers<[1], [0], [0], [1], [0, 0, 1, 1], [], []>} : vector<16x3xf32>, vector<3x64xf32>, vector<16x64xf32> -> vector<16x64xf32>
    %c0_3 = arith.constant 0 : index
    %c0_4 = arith.constant 0 : index
    %3 = vector.load %arg4[%c0_3, %c0_4] : memref<1x64xf32, #tpu.memory_space<vmem>>, vector<1x64xf32>
    %4 = vector.broadcast %3 : vector<1x64xf32> to vector<16x64xf32>
    %5 = arith.addf %2, %4 : vector<16x64xf32>
    %6 = math.sin %5 : vector<16x64xf32>
    %c0_5 = arith.constant 0 : index
    %c0_6 = arith.constant 0 : index
    %7 = vector.load %arg5[%c0_5, %c0_6] : memref<16x64xf32, #tpu.memory_space<vmem>>, vector<16x64xf32>
    tpu.vector_store %arg5[%c0_5, %c0_6], %6 {strides = array<i32>} : memref<16x64xf32, #tpu.memory_space<vmem>>, vector<16x64xf32>,
    return
  }
  func.func @transform_0(%arg0: i32, %arg1: i32) -> (i32, i32) {
    %c0_i32 = arith.constant 0 : i32
    %c0_i32_0 = arith.constant 0 : i32
    return %arg0, %c0_i32 : i32, i32
  }
  func.func @transform_1(%arg0: i32, %arg1: i32) -> (i32, i32) {
    %c0_i32 = arith.constant 0 : i32
    %c0_i32_0 = arith.constant 0 : i32
    return %c0_i32, %arg1 : i32, i32
  }
  func.func @transform_2(%arg0: i32, %arg1: i32) -> (i32, i32) {
    %c0_i32 = arith.constant 0 : i32
    %c0_i32_0 = arith.constant 0 : i32
    return %c0_i32, %arg1 : i32, i32
  }
  func.func @transform_3(%arg0: i32, %arg1: i32) -> (i32, i32) {
    %c0_i32 = arith.constant 0 : i32
    return %arg0, %arg1 : i32, i32
  }
}

</mosaic_0001>

<bundles_post_ra>
// kernel: tpu_custom_call.1
= control target key start
LH: loop header
LB: loop body
LE: loop exit
PB: predicated region body
PF: predicated region fallthrough
CT: control target
= control target key end

     0   :  { %8 = vsyncpa [#allocation3], 0  ;;  %s1182_s0 = inlined_call_operand.vmem [shape: f32[32,3], index: 0, kind: input, shape index: {}]   ;;  %s1183_s1 = inlined_call_operand.vmem [shape: f32[3,64], index: 1, kind: input, shape index: {}]   ;;  %s1184_s2 = inlined_call_operand.vmem [shape: f32[1,64], index: 2, kind: input, shape index: {}]   ;;  %s1185_s3 = inlined_call_operand.hbm [shape: f32[32,64], index: 3, kind: output, shape index: {}]  }
   0x1   :  { %10 = vsyncpa [#allocation3 + $0x1], 0  ;;  %s887_s12 = smov 0   ;;  %s889_s13 = smov 0  }
   0x2   :  { %s891_s14 = smov 0   ;;  %s893_s15 = smov 0  }
   0x3   :  { %s895_s16 = smov 0   ;;  %s897_s17 = smov 0  }
   0x4 LB: > { %s687_s18 = sadd.s32 4294967295, %s856_s17   ;;  %s688_s19 = sadd.s32 4294967294, %s856_s17   ;;  %s856_s17 = sphi %s897_s17, %s16_s17   ;;  %s852_s16 = sphi %s895_s16, %s1196_s16   ;;  %s848_s15 = sphi %s893_s15, %s1195_s15   ;;  %s844_s14 = sphi %s891_s14, %s1194_s14   ;;  %s840_s13 = sphi %s889_s13, %s1193_s13   ;;  %s836_s12 = sphi %s887_s12, %s1192_s12  }
   0x5   : > { %s28_s20 = sadd.s32 1, %s852_s16  ;;  %s115_s21 = sadd.s32 1, %s844_s14 }
   0x6   : > { %p30_p0 = scmp.ge.s32.totalorder %s28_s20, 2  ;;  %p125_p1 = scmp.ne.s32.totalorder %s844_s14, %s840_s13 }
   0x7   : > { %p126_p2 = scmp.eq.s32.totalorder %s687_s18, 1  ;;  %p131_p3 = scmp.ne.s32.totalorder %s840_s13, %s836_s12 }
   0x8   : > { %s1198_s20 = smov (%p30_p0, %s28_s20), 0  ;;  %p132_p5 = scmp.eq.s32.totalorder %s688_s19, 1 }
   0x9   : > { %p927_p4 = por %p126_p2, %p125_p1  ;;  %s110_s23 = ssub.s32 %s852_s16, %s1198_s20 }
   0xa   : > { %p693_p6 = scmp.ge.s32.totalorder %s856_s17, 1  ;;  %p113_p7 = scmp.eq.s32.totalorder %s110_s23, 0 }
   0xb   : > { %p934_p8 = por %p132_p5, %p131_p3  ;;  %p172_p9 = scmp.lt.s32.totalorder %s856_s17, 3 }
   0xc   : > { %s940_s25 = scalar_select %p113_p7, %s844_s14, %s115_s21  }
   0xd   : > { %p173_p10 = pnand %p693_p6, %p172_p9 }
   0xe   : > { %s695_s28 = sshll.u32 (!%p173_p10), %s848_s15, 1  ;;  %s200_s8 = sand.u32 (!%p173_p10), 1, %s840_s13  }
   0xf   : > { %176 = sbr.rel (%p173_p10) target bundleno = 269 (0x10d), region = 32  ;;  %p204_p11 = scmp.lt.s32.totalorder (!%p173_p10), %s695_s28, 3 }
  0x10   : > { %s694_s9 = sshll.u32 (!%p173_p10), %s200_s8, 4  ;;  %s711_s11 = sshll.u32 (!%p173_p10), %s848_s15, 4 }
  0x11   : > { %s1134_s10 = scalar_lea.vmem (!%p173_p10), [#allocation2], %s694_s9  ;;  %s584_s21 = scalar_lea.hbm (!%p173_p10), %s1185_s3, %s711_s11 }
  0x12   : > { %s585_s23 = sshll.u32 (!%p173_p10), %s1134_s10, 4  ;;  %s587_s26 = sshll.u32 (!%p173_p10), %s584_s21, 4  ;;  %s586_s23 = int_to_ptr.vmem [resolvable:$true] %s585_s23  ;;  %s588_s26 = int_to_ptr.hbm [resolvable:$true] %s587_s26 }
  0x13   : > { %s572_s15 = scalar_lea.sflag (!%p173_p10), [#allocation3], %s200_s8  ;;  %s792_s27 = sshra.s32 (!%p173_p10), %s588_s26, 4  ;;  %s793_s27 = int_to_ptr.hbm [resolvable:$true] %s792_s27 }
  0x14   : > { %v219_v0 = vld [vmem:[%s1183_s1] sm:$0x7]  ;;  %vm231_vm0 = vcmask 1042432   ;;  %s1200_s28 = smov (!%p204_p11, %s695_s28), 3  ;;  %vm224_vm1 = vcmask 23552   ;;  %s798_s4 = scalar_lea.hbm %s1185_s3, 32 }
  0x15   : > { %697 = vmatpush.msk.msra.mxu0 %vm231_vm0, %v219_v0  ;;  %712 = vmatpush.msk.msra.mxu1 %vm231_vm0, %v219_v0  ;;  %s696_s29 = sshll.u32 %s1200_s28, 3  ;;  %v777_v3 = vld [vmem:[%s1184_s2] ss:$0 sm:$0xff]  ;;  %v858_v31 = vmov 683565275   ;;  %s794_s28 = scalar_lea.hbm %s793_s27, 16 }
  0x16   : > { %s207_s5 = scalar_lea.vmem %s1182_s0, %s696_s29  ;;  %v859_v33 = vmov 2475754826   ;;  %v860_v37 = vmov 2131351028   ;;  %v861_v40 = vmov 2102212464   ;;  %p795_p12 = scmp.ne.s32.totalorder %s793_s27, %s794_s28 }
  0x17   : > { %v217_v1 = vld [vmem:[%s207_s5] sm:$0xff]  ;;  %v218_v2 = vld [vmem:[%s207_s5 + $0x8] sm:$0xff]  ;;  %v862_v43 = vmov 920167782   ;;  %v863_v46 = vmov 1326507024   ;;  %p799_p1 = scmp.lt.s32.totalorder %s793_s27, %s1185_s3  ;;  %p800_p2 = scmp.lt.s32.totalorder %s798_s4, %s794_s28 }
  0x18   : > { %698 = vmatmul.msk.f32.vlgmr.msra.gmra.mxu0 %vm224_vm1, %v217_v1  ;;  %699 = vmatmul.msk.f32.vlgmr.msra.gmra.mxu1 %vm224_vm1, %v218_v2  ;;  %p796_p13 = pnand %p795_p12, %p927_p4 }
  0x19   : > { %p801_p3 = por %p800_p2, %p799_p1 }
  0x1a   : > { %p797_p0 = pneg %p796_p13 }
  0x1c   : > { %p802_p5 = pnand %p801_p3, %p797_p0 }
  0x95   : > { %v252_v4 = vpop.f32.mrf.mxu0  ;;  %v255_v5 = vpop.f32.mrf.mxu1 }
  0x96   : > { %v952_v6 = vadd.f32 %v777_v3, %v252_v4  ;;  %v954_v7 = vadd.f32 %v777_v3, %v255_v5 }
  0x98   : > { %v258_v8 = vand.u32 2147483647, %v952_v6  ;;  %v261_v9 = vand.u32 2139095040, %v952_v6  ;;  %v413_v10 = vand.u32 2147483647, %v954_v7  ;;  %v416_v11 = vand.u32 2139095040, %v954_v7 }
  0x9a   : > { %v262_v12 = vshrl.u32 %v261_v9, 23  ;;  %v265_v13 = vand.u32 8388607, %v258_v8  ;;  %v417_v14 = vshrl.u32 %v416_v11, 23  ;;  %v420_v17 = vand.u32 8388607, %v413_v10 }
  0x9c   : > { %v700_v15 = vadd.s32 4294967169, %v262_v12  ;;  %v266_v16 = vor.u32 8388608, %v265_v13  ;;  %v703_v18 = vadd.s32 4294967169, %v417_v14  ;;  %v421_v22 = vor.u32 8388608, %v420_v17 }
  0x9e   : > { %v268_v19 = vadd.s32 1, %v700_v15  ;;  %v423_v20 = vadd.s32 1, %v703_v18  ;;  %v964_v21 = vshll.u32 %v266_v16, 8  ;;  %v971_v29 = vshll.u32 %v421_v22, 8 }
  0xa0   : > { %vm269_vm2 = vcmp.gt.s32.totalorder %v268_v19, 0  ;;  %vm424_vm3 = vcmp.gt.s32.totalorder %v423_v20, 0  ;;  %v967_v27 = vand.u32 65535, %v964_v21  ;;  %v308_v35 = vshrl.u32 %v964_v21, 16 }
  0xa1   : > { %v270_v23 = vsel %vm269_vm2, %v268_v19, 0  ;;  %v425_v25 = vsel %vm424_vm3, %v423_v20, 0 }
  0xa2   : > { %v272_v24 = vand.u32 31, %v270_v23  ;;  %v969_v28 = vand.u32 31, %v425_v25  ;;  %v973_v30 = vshrl.u32 %v270_v23, 5  ;;  %v1011_v14 = vshrl.u32 %v425_v25, 5 }
  0xa4   : > { %v273_v26 = vsub.s32 32, %v272_v24  ;;  %v275_v32 = vshll.u32 %v858_v31, %v272_v24  ;;  %v278_v34 = vshll.u32 %v859_v33, %v272_v24  ;;  %v281_v39 = vshll.u32 %v860_v37, %v272_v24 }
  0xa5   : > { %v284_v42 = vshll.u32 %v861_v40, %v272_v24  ;;  %v287_v45 = vshll.u32 %v862_v43, %v272_v24  ;;  %v983_v51 = vsub.s32 32, %v969_v28  ;;  %vm290_vm4 = vcmp.lt.s32.totalorder %v973_v30, 1 }
  0xa6   : > { %v276_v36 = vshrl.u32 %v859_v33, %v273_v26  ;;  %v279_v38 = vshrl.u32 %v860_v37, %v273_v26  ;;  %v282_v41 = vshrl.u32 %v861_v40, %v273_v26  ;;  %v285_v44 = vshrl.u32 %v862_v43, %v273_v26 }
  0xa7   : > { %v288_v47 = vshrl.u32 %v863_v46, %v273_v26  ;;  %vm291_vm5 = vcmp.lt.s32.totalorder %v973_v30, 2  ;;  %v274_v54 = vshrl.u32 %v858_v31, %v273_v26  ;;  %vm293_vm6 = vcmp.lt.s32.totalorder %v973_v30, 4 }
  0xa8   : > { %v277_v48 = vor.u32 %v276_v36, %v275_v32  ;;  %v280_v49 = vor.u32 %v279_v38, %v278_v34  ;;  %v283_v50 = vor.u32 %v282_v41, %v281_v39  ;;  %v286_v52 = vor.u32 %v285_v44, %v284_v42 }
  0xa9   : > { %v289_v53 = vor.u32 %v288_v47, %v287_v45  ;;  %vm292_vm7 = vcmp.lt.s32.totalorder %v973_v30, 3  ;;  %v430_v59 = vshll.u32 %v858_v31, %v969_v28  ;;  %v431_v63 = vshrl.u32 %v859_v33, %v983_v51 }
  0xaa   : > { %v298_v55 = vsel %vm290_vm4, %v277_v48, %v280_v49  ;;  %v302_v56 = vsel %vm290_vm4, %v280_v49, %v283_v50  ;;  %v299_v57 = vsel %vm293_vm6, %v286_v52, 920167782  ;;  %v295_v60 = vsel %vm293_vm6, %v283_v50, 2102212464 }
  0xab   : > { %v303_v58 = vsel %vm293_vm6, %v289_v53, 1326507024  ;;  %v300_v61 = vsel %vm292_vm7, %v283_v50, %v299_v57  ;;  %v433_v2 = vshll.u32 %v859_v33, %v969_v28  ;;  %v434_v3 = vshrl.u32 %v860_v37, %v983_v51 }
  0xac   : > { %v304_v62 = vsel %vm292_vm7, %v286_v52, %v303_v58  ;;  %v301_v0 = vsel %vm291_vm5, %v298_v55, %v300_v61  ;;  %v294_v12 = vsel %vm290_vm4, %v274_v54, %v277_v48  ;;  %v296_v13 = vsel %vm292_vm7, %v280_v49, %v295_v60 }
  0xad   : > { %v305_v1 = vsel %vm291_vm5, %v302_v56, %v304_v62  ;;  %v331_v9 = vand.u32 65535, %v301_v0  ;;  %v332_v11 = vshrl.u32 %v301_v0, 16  ;;  %v1013_v15 = vor.u32 %v431_v63, %v430_v59 }
  0xae   : > { %v309_v4 = vand.u32 65535, %v305_v1  ;;  %v310_v5 = vshrl.u32 %v305_v1, 16  ;;  %v1016_v18 = vor.u32 %v434_v3, %v433_v2  ;;  %v437_v19 = vshrl.u32 %v861_v40, %v983_v51 }
  0xaf   : > { %v334_v22 = vmul.u32 %v332_v11, %v967_v27  ;;  %v335_v23 = vmul.u32 %v331_v9, %v308_v35  ;;  %v436_v24 = vshll.u32 %v860_v37, %v969_v28  ;;  %v333_v32 = vmul.u32 %v331_v9, %v967_v27 }
  0xb0   : > { %v312_v16 = vmul.u32 %v310_v5, %v967_v27  ;;  %v313_v17 = vmul.u32 %v309_v4, %v308_v35  ;;  %v311_v20 = vmul.u32 %v309_v4, %v967_v27  ;;  %v314_v26 = vmul.u32 %v310_v5, %v308_v35 }
  0xb1   : > { %v336_v33 = vmul.u32 %v332_v11, %v308_v35  ;;  %v337_v39 = vshll.u32 %v334_v22, 16  ;;  %v339_v42 = vshll.u32 %v335_v23, 16  ;;  %v1024_v44 = vor.u32 %v437_v19, %v436_v24 }
  0xb2   : > { %v315_v25 = vshll.u32 %v312_v16, 16  ;;  %v316_v34 = vshrl.u32 %v312_v16, 16  ;;  %v317_v36 = vshll.u32 %v313_v17, 16  ;;  %v318_v38 = vshrl.u32 %v313_v17, 16 }
  0xb3   : > { %v864_v45 = vmov 0   ;;  %vm341_vm9 = vc.u32 %v333_v32, %v337_v39  ;;  %v343_v48 = vadd.s32 %v337_v39, %v333_v32  ;;  %v440_v37 = vshrl.u32 %v862_v43, %v983_v51 }
  0xb4   : > { %vm319_vm8 = vc.u32 %v311_v20, %v315_v25  ;;  %v321_v41 = vadd.s32 %v315_v25, %v311_v20  ;;  %v342_v27 = vsel %vm341_vm9, 1, %v864_v45  ;;  %v439_v35 = vshll.u32 %v861_v40, %v969_v28 }
  0xb5   : > { %v320_v47 = vsel %vm319_vm8, 1, %v864_v45  ;;  %v344_v52 = vadd.s32 %v342_v27, %v336_v33  ;;  %vm345_vm11 = vc.u32 %v343_v48, %v339_v42  ;;  %v442_v53 = vshll.u32 %v862_v43, %v969_v28 }
  0xb6   : > { %v322_v49 = vadd.s32 %v320_v47, %v314_v26  ;;  %vm323_vm10 = vc.u32 %v321_v41, %v317_v36  ;;  %v346_v55 = vsel %vm345_vm11, 1, %v864_v45  ;;  %v441_v56 = vor.u32 %v440_v37, %v439_v35 }
  0xb7   : > { %v324_v50 = vsel %vm323_vm10, 1, %v864_v45  ;;  %v443_v57 = vshrl.u32 %v863_v46, %v983_v51  ;;  %v338_v58 = vshrl.u32 %v334_v22, 16  ;;  %v340_v59 = vshrl.u32 %v335_v23, 16 }
  0xb8   : > { %v326_v54 = vadd.s32 %v324_v50, %v322_v49  ;;  %v1038_v60 = vadd.s32 %v343_v48, %v339_v42  ;;  %v348_v61 = vadd.s32 %v346_v55, %v344_v52  ;;  %vm445_vm12 = vcmp.lt.s32.totalorder %v1011_v14, 1 }
  0xb9   : > { %v444_v62 = vor.u32 %v443_v57, %v442_v53  ;;  %vm448_vm13 = vcmp.lt.s32.totalorder %v1011_v14, 4  ;;  %vm447_vm14 = vcmp.lt.s32.totalorder %v1011_v14, 3  ;;  %v453_v28 = vsel %vm445_vm12, %v1013_v15, %v1016_v18 }
  0xba   : > { %v327_v40 = vadd.s32 %v326_v54, %v316_v34  ;;  %v349_v63 = vadd.s32 %v348_v61, %v338_v58  ;;  %v454_v43 = vsel %vm448_vm13, %v441_v56, 920167782  ;;  %vm446_vm15 = vcmp.lt.s32.totalorder %v1011_v14, 2 }
  0xbb   : > { %v455_v0 = vsel %vm447_vm14, %v1024_v44, %v454_v43  ;;  %v457_v1 = vsel %vm445_vm12, %v1016_v18, %v1024_v44  ;;  %v297_v2 = vsel %vm291_vm5, %v294_v12, %v296_v13  ;;  %v458_v5 = vsel %vm448_vm13, %v444_v62, 1326507024 }
  0xbc   : > { %v1049_v46 = vadd.s32 %v327_v40, %v318_v38  ;;  %v350_v3 = vadd.s32 %v349_v63, %v340_v59  ;;  %v456_v4 = vsel %vm446_vm15, %v453_v28, %v455_v0  ;;  %v459_v9 = vsel %vm447_vm14, %v441_v56, %v458_v5 }
  0xbd   : > { %v462_v11 = vand.u32 65535, %v971_v29  ;;  %v486_v16 = vand.u32 65535, %v456_v4  ;;  %v460_v30 = vsel %vm446_vm15, %v457_v1, %v459_v9  ;;  %v463_v12 = vshrl.u32 %v971_v29, 16 }
  0xbe   : > { %vm353_vm0 = vc.u32 %v1049_v46, %v1038_v60  ;;  %v354_v17 = vadd.s32 1, %v350_v3  ;;  %v487_v13 = vshrl.u32 %v456_v4, 16  ;;  %v351_v19 = vmul.u32 %v964_v21, %v297_v2 }
  0xbf   : > { %v464_v20 = vand.u32 65535, %v460_v30  ;;  %v465_v22 = vshrl.u32 %v460_v30, 16  ;;  %v490_v26 = vmul.u32 %v486_v16, %v463_v12  ;;  %v488_v34 = vmul.u32 %v486_v16, %v462_v11 }
  0xc0   : > { %v355_v23 = vsel %vm353_vm0, %v354_v17, %v350_v3  ;;  %v489_v24 = vmul.u32 %v487_v13, %v462_v11  ;;  %v491_v36 = vmul.u32 %v487_v13, %v463_v12  ;;  %v450_v54 = vsel %vm448_vm13, %v1024_v44, 2102212464 }
  0xc1   : > { %v356_v25 = vadd.s32 %v355_v23, %v351_v19  ;;  %v467_v32 = vmul.u32 %v465_v22, %v462_v11  ;;  %v468_v33 = vmul.u32 %v464_v20, %v463_v12  ;;  %v466_v41 = vmul.u32 %v464_v20, %v462_v11 }
  0xc2   : > { %v492_v38 = vshll.u32 %v489_v24, 16  ;;  %v469_v42 = vmul.u32 %v465_v22, %v463_v12  ;;  %v494_v37 = vshll.u32 %v490_v26, 16  ;;  %v429_v56 = vshrl.u32 %v858_v31, %v983_v51 }
  0xc3   : > { %v357_v39 = vadd.s32 536870912, %v356_v25  ;;  %v470_v47 = vshll.u32 %v467_v32, 16  ;;  %v472_v48 = vshll.u32 %v468_v33, 16  ;;  %v471_v61 = vshrl.u32 %v467_v32, 16 }
  0xc4   : > { %vm496_vm1 = vc.u32 %v488_v34, %v492_v38  ;;  %v498_v49 = vadd.s32 %v492_v38, %v488_v34  ;;  %v449_v63 = vsel %vm445_vm12, %v429_v56, %v1013_v15  ;;  %v451_v44 = vsel %vm447_vm14, %v1016_v18, %v450_v54 }
  0xc5   : > { %v1074_v21 = vshrl.u32 %v357_v39, 30  ;;  %vm474_vm2 = vc.u32 %v466_v41, %v470_v47  ;;  %v476_v27 = vadd.s32 %v470_v47, %v466_v41  ;;  %v497_v35 = vsel %vm496_vm1, 1, %v864_v45 }
  0xc6   : > { %v475_v50 = vsel %vm474_vm2, 1, %v864_v45  ;;  %v499_v52 = vadd.s32 %v497_v35, %v491_v36  ;;  %vm500_vm3 = vc.u32 %v498_v49, %v494_v37  ;;  %v493_v28 = vshrl.u32 %v489_v24, 16 }
  0xc7   : > { %v359_v53 = vshll.u32 %v1074_v21, 30  ;;  %v477_v55 = vadd.s32 %v475_v50, %v469_v42  ;;  %vm478_vm4 = vc.u32 %v476_v27, %v472_v48  ;;  %v501_v58 = vsel %vm500_vm3, 1, %v864_v45 }
  0xc8   : > { %v479_v57 = vsel %vm478_vm4, 1, %v864_v45  ;;  %v503_v62 = vadd.s32 %v501_v58, %v499_v52  ;;  %v473_v31 = vshrl.u32 %v468_v33, 16  ;;  %v495_v0 = vshrl.u32 %v490_v26, 16 }
  0xc9   : > { %v360_v59 = vsub.s32 %v356_v25, %v359_v53  ;;  %v481_v40 = vadd.s32 %v479_v57, %v477_v55  ;;  %v502_v3 = vadd.s32 %v498_v49, %v494_v37  ;;  %v452_v5 = vsel %vm446_vm15, %v449_v63, %v451_v44 }
  0xca   : > { %v504_v1 = vadd.s32 %v503_v62, %v493_v28  ;;  %v506_v18 = vmul.u32 %v971_v29, %v452_v5  ;;  %v352_v12 = vadd.s32 %v1038_v60, %v1049_v46  ;;  %vm260_vm9 = vcmp.lt.s32.totalorder %v952_v6, 0 }
  0xcb   : > { %vm361_vm5 = vcmp.lt.s32.totalorder %v360_v59, 0  ;;  %v362_v43 = vsub.s32 0, %v360_v59  ;;  %v482_v51 = vadd.s32 %v481_v40, %v471_v61  ;;  %v382_v42 = vsub.s32 4, %v1074_v21 }
  0xcc   : > { %v505_v9 = vadd.s32 %v504_v1, %v495_v0  ;;  %vm1104_vm10 = vcmp.le.f32.partialorder %v258_v8, 0.7853982  ;;  %vm415_vm12 = vcmp.lt.s32.totalorder %v954_v7, 0  ;;  %vm1120_vm13 = vcmp.le.f32.partialorder %v413_v10, 0.7853982 }
  0xcd   : > { %v363_v45 = vsel %vm361_vm5, %v362_v43, %v360_v59  ;;  %v483_v2 = vadd.s32 %v482_v51, %v473_v31  ;;  %v383_v35 = vsel %vm260_vm9, %v382_v42, %v1074_v21  ;;  %vm568_vm1 = vcmask 523264  }
  0xce   : > { %v364_v4 = vclz %v363_v45  ;;  %v509_v11 = vadd.s32 1, %v505_v9  ;;  %v385_v61 = vsel %vm1104_vm10, 0, %v383_v35  ;;  %vm401_vm2 = vweird.f32 %v952_v6 }
  0xcf   : > { %vm508_vm6 = vc.u32 %v483_v2, %v502_v3  ;;  %v507_v53 = vadd.s32 %v502_v3, %v483_v2  ;;  %v402_v43 = vadd.s32 3, %v385_v61 }
  0xd0   : > { %v701_v15 = vadd.s32 4294967294, %v364_v4  ;;  %v510_v16 = vsel %vm508_vm6, %v509_v11, %v505_v9  ;;  %vm556_vm6 = vweird.f32 %v954_v7 }
  0xd1   : > { %v511_v30 = vadd.s32 %v510_v16, %v506_v18  ;;  %v403_v4 = vand.u32 3, %v402_v43 }
  0xd2   : > { %vm702_vm7 = vcmp.lt.s32.totalorder %v701_v15, 0 }
  0xd3   : > { %v367_v17 = vsel %vm702_vm7, 0, %v701_v15  ;;  %v512_v20 = vadd.s32 536870912, %v511_v30  ;;  %vm404_vm14 = vcmp.lt.s32.totalorder %v403_v4, 2  ;;  %vm405_vm15 = vcmp.eq.s32.totalorder %v403_v4, 0 }
  0xd4   : > { %v368_v13 = vsub.s32 32, %v367_v17  ;;  %v372_v19 = vsub.s32 4294967266, %v367_v17  ;;  %v369_v22 = vshll.u32 %v360_v59, %v367_v17  ;;  %vm408_vm0 = vcmp.eq.s32.totalorder %v403_v4, 2 }
  0xd5   : > { %v1097_v24 = vshrl.u32 %v512_v20, 30 }
  0xd6   : > { %v370_v23 = vshrl.u32 %v352_v12, %v368_v13  ;;  %v373_v14 = vadd.s32 127, %v372_v19 }
  0xd7   : > { %v514_v32 = vshll.u32 %v1097_v24, 30  ;;  %v537_v12 = vsub.s32 4, %v1097_v24 }
  0xd8   : > { %v371_v26 = vor.u32 %v370_v23, %v369_v22  ;;  %v374_v25 = vshll.u32 %v373_v14, 23 }
  0xd9   : > { %v515_v33 = vsub.s32 %v511_v30, %v514_v32 }
  0xda   : > { %v375_v29 = vor.u32 4788187, %v374_v25  ;;  %v378_v36 = vcvt.s32.f32 %v371_v26  ;;  %v538_v25 = vsel %vm415_vm12, %v537_v12, %v1097_v24 }
  0xdb   : > { %vm516_vm8 = vcmp.lt.s32.totalorder %v515_v33, 0  ;;  %v517_v38 = vsub.s32 0, %v515_v33 }
  0xdc   : > { %v376_v34 = vand.u32 2147483647, %v375_v29 }
  0xdd   : > { %v518_v60 = vsel %vm516_vm8, %v517_v38, %v515_v33 }
  0xde   : > { %v379_v39 = vmul.f32 %v378_v36, %v376_v34  ;;  %v519_v41 = vclz %v518_v60 }
  0xe0   : > { %v380_v46 = vxor.u32 2147483648, %v379_v39  ;;  %v704_v37 = vadd.s32 4294967294, %v519_v41 }
  0xe2   : > { %v381_v48 = vsel %vm260_vm9, %v380_v46, %v379_v39  ;;  %vm705_vm11 = vcmp.lt.s32.totalorder %v704_v37, 0 }
  0xe3   : > { %v384_v49 = vsel %vm1104_vm10, %v952_v6, %v381_v48  ;;  %v522_v50 = vsel %vm705_vm11, 0, %v704_v37  ;;  %v540_v6 = vsel %vm1120_vm13, 0, %v538_v25 }
  0xe4   : > { %v386_v27 = vmul.f32 %v384_v49, %v384_v49  ;;  %v523_v54 = vsub.s32 32, %v522_v50  ;;  %v527_v55 = vsub.s32 4294967266, %v522_v50  ;;  %v524_v57 = vshll.u32 %v515_v33, %v522_v50 }
  0xe5   : > { %v557_v39 = vadd.s32 3, %v540_v6 }
  0xe6   : > { %v394_v52 = vmul.f32 -0.00019511016, %v386_v27  ;;  %v387_v56 = vmul.f32 -0.001358992, %v386_v27  ;;  %v525_v58 = vshrl.u32 %v507_v53, %v523_v54  ;;  %v528_v59 = vadd.s32 127, %v527_v55 }
  0xe7   : > { %v558_v42 = vand.u32 3, %v557_v39 }
  0xe8   : > { %v395_v8 = vadd.f32 0.008332121, %v394_v52  ;;  %v388_v40 = vadd.f32 0.041655596, %v387_v56  ;;  %v526_v63 = vor.u32 %v525_v58, %v524_v57  ;;  %v529_v44 = vshll.u32 %v528_v59, 23 }
  0xe9   : > { %vm560_vm3 = vcmp.eq.s32.totalorder %v558_v42, 0  ;;  %vm563_vm4 = vcmp.eq.s32.totalorder %v558_v42, 2  ;;  %vm559_vm5 = vcmp.lt.s32.totalorder %v558_v42, 2 }
  0xea   : > { %v396_v62 = vmul.f32 %v395_v8, %v386_v27  ;;  %v389_v28 = vmul.f32 %v388_v40, %v386_v27  ;;  %v530_v31 = vor.u32 4788187, %v529_v44  ;;  %v533_v45 = vcvt.s32.f32 %v526_v63 }
  0xec   : > { %v397_v21 = vadd.f32 -0.16666654, %v396_v62  ;;  %v390_v51 = vadd.f32 -0.4999988, %v389_v28  ;;  %v531_v1 = vand.u32 2147483647, %v530_v31 }
  0xee   : > { %v398_v0 = vmul.f32 %v397_v21, %v386_v27  ;;  %v391_v2 = vmul.f32 %v390_v51, %v386_v27  ;;  %v534_v5 = vmul.f32 %v533_v45, %v531_v1 }
  0xf0   : > { %v399_v3 = vadd.f32 1.0, %v398_v0  ;;  %v392_v9 = vadd.f32 1.0, %v391_v2  ;;  %v535_v11 = vxor.u32 2147483648, %v534_v5 }
  0xf2   : > { %v400_v15 = vmul.f32 %v399_v3, %v384_v49  ;;  %v409_v18 = vxor.u32 2147483648, %v392_v9  ;;  %v536_v30 = vsel %vm415_vm12, %v535_v11, %v534_v5 }
  0xf3   : > { %v539_v13 = vsel %vm1120_vm13, %v954_v7, %v536_v30 }
  0xf4   : > { %v406_v16 = vxor.u32 2147483648, %v400_v15  ;;  %v541_v19 = vmul.f32 %v539_v13, %v539_v13  ;;  %v410_v22 = vsel %vm408_vm0, %v409_v18, %v400_v15 }
  0xf6   : > { %v407_v20 = vsel %vm405_vm15, %v392_v9, %v406_v16  ;;  %v549_v23 = vmul.f32 -0.00019511016, %v541_v19  ;;  %v542_v26 = vmul.f32 -0.001358992, %v541_v19 }
  0xf7   : > { %v411_v10 = vsel %vm404_vm14, %v407_v20, %v410_v22 }
  0xf8   : > { %v412_v14 = vsel %vm401_vm2, nan, %v411_v10  ;;  %v550_v32 = vadd.f32 0.008332121, %v549_v23  ;;  %v543_v29 = vadd.f32 0.041655596, %v542_v26 }
  0xf9   : > { %569 = vst.msk [vmem:[%s1134_s10] sm:$0xff] %vm568_vm1, %v412_v14 }
  0xfa   : > { %v551_v33 = vmul.f32 %v550_v32, %v541_v19  ;;  %v544_v34 = vmul.f32 %v543_v29, %v541_v19 }
  0xfc   : > { %v552_v36 = vadd.f32 -0.16666654, %v551_v33  ;;  %v545_v38 = vadd.f32 -0.4999988, %v544_v34 }
  0xfe   : > { %v553_v60 = vmul.f32 %v552_v36, %v541_v19  ;;  %v546_v46 = vmul.f32 %v545_v38, %v541_v19 }
 0x100   : > { %v554_v24 = vadd.f32 1.0, %v553_v60  ;;  %v547_v41 = vadd.f32 1.0, %v546_v46 }
 0x102   : > { %v555_v47 = vmul.f32 %v554_v24, %v539_v13  ;;  %v564_v48 = vxor.u32 2147483648, %v547_v41 }
 0x104   : > { %v561_v37 = vxor.u32 2147483648, %v555_v47  ;;  %v565_v27 = vsel %vm563_vm4, %v564_v48, %v555_v47 }
 0x106   : > { %v562_v49 = vsel %vm560_vm3, %v547_v41, %v561_v37 }
 0x107   : > { %v566_v35 = vsel %vm559_vm5, %v562_v49, %v565_v27 }
 0x108   : > { %v567_v50 = vsel %vm556_vm6, nan, %v566_v35 }
 0x109   : > { %570 = vst.msk [vmem:[%s1134_s10 + $0x8] sm:$0xff] %vm568_vm1, %v567_v50 }
 0x10a   : > { %805 = shalt.err (!%p802_p5)
}
 0x10b   : > { %s865_s7 = smov 128   ;;  %s866_s8 = smov 8  }
 0x10c   : > { %713 = dma.vmem_to_hbm [thread:$0]  (%p927_p4), %s586_s23, 256, %s588_s26, %s572_s15, %s865_s7, %s865_s7, %s866_s8  }
 0x10d PF: > { %p719_p6 = scmp.ge.s32.totalorder %s856_s17, 2  ;;  %s602_s9 = sand.u32 1, %s836_s12  }
 0x10e   : > { %s603_s10 = scalar_lea.sflag [#allocation3], %s602_s9 }
 0x10f   : > { %p716_p7 = pnand %p719_p6, %p934_p8 }
 0x111   : > { %p717_p9 = pneg %p716_p7 }
 0x113   : > { %831 = dma.done.wait (%p717_p9), %s603_s10, 256  }
 0x114   : > { %833 = vsyncadd (%p717_p9), %s603_s10, 4294967040  ;;  %s16_s17 = sadd.s32 1, %s856_s17   ;;  %s1192_s12 = smov %s840_s13 }
 0x115   : > { %p13_p10 = scmp.ge.s32.totalorder %s16_s17, 4   ;;  %s1193_s13 = smov %s844_s14 }
 0x116   : > { %s1194_s14 = smov %s940_s25  ;;  %s1195_s15 = smov %s852_s16 }
 0x117   : > { %s1196_s16 = smov %s1198_s20  ;;  %15 = sbr.rel (!%p13_p10) target bundleno = 4 (0x4), region = 73 }
 0x11c   :  { %609 = vsyncpa [#allocation3], 1 }
 0x11d   :  { %611 = vsyncpa [#allocation3 + $0x1], 1 }

</bundles_post_ra>
